<compile_context>
chip_gen: v5e
topology: v5e:2x2
jax: 0.10.0
libtpu: 0.0.40
codegen_flags: <defaults>
</compile_context>

<pallas_src>
import functools

import jax
import jax.numpy as jnp
from jax.experimental import pallas as pl
from jax.experimental.pallas import tpu as pltpu


def _round_down(n: int, m: int) -> int:
    return (n // m) * m


def _vmem_capacity_bytes() -> int:
    """Per-TensorCore VMEM capacity; conservative fallback if query fails."""
    try:
        cap = getattr(pltpu.get_tpu_info(), "vmem_capacity_bytes", None)
        if cap:
            return int(cap)
    except Exception:
        pass
    return 64 * 1024 * 1024  # v7x per-TC size; safe lower bound everywhere


def _finalpool_kernel(x_ref, o_ref, acc_ref, *, seq_len, mask_value, needs_mask):
    # Grid: (batch blocks [parallel], channel blocks [parallel], T blocks
    # [arbitrary, innermost]).
    t = pl.program_id(2)
    bt, tt, ct = x_ref.shape
    fold_rows = acc_ref.shape[1]

    x = x_ref[...]

    if needs_mask:
        # The last T tile may read past the true sequence length (Pallas pads
        # the ragged boundary block with unspecified data): replace those rows
        # with the identity of max. VPU-only work, free under the HBM roofline.
        row = jax.lax.broadcasted_iota(jnp.int32, (bt, tt, ct), 1)
        x = jnp.where(t * tt + row < seq_len, x, mask_value)

    if tt == fold_rows:
        folded = x
    else:
        # Fold the T tile down to `fold_rows` sublanes using only elementwise
        # (VPU) maxima; the single cross-sublane (XLU) reduction happens once
        # in the epilogue instead of every grid step.
        folded = jnp.max(x.reshape(bt, tt // fold_rows, fold_rows, ct), axis=1)

    @pl.when(t == 0)
    def _():
        # Initialize from the first tile's values: correct for integer dtypes
        # and float formats without an inf encoding (no -inf fill needed).
        acc_ref[...] = folded

    @pl.when(t > 0)
    def _():
        acc_ref[...] = jnp.maximum(acc_ref[...], folded)

    @pl.when(t == pl.num_programs(2) - 1)
    def _():
        o_ref[...] = jnp.max(acc_ref[...], axis=1)


def final_pool(x: jax.Array) -> jax.Array:
    """Pallas equivalent of FinalPool.forward: x (B, T, C) -> (B, C)."""
    B, T, C = x.shape
    dtype = x.dtype
    itemsize = jnp.dtype(dtype).itemsize
    pack = max(8, 32 // itemsize)  # sublane packing: 8 (f32) / 16 (bf16) / 32 (i8)

    if jnp.issubdtype(dtype, jnp.floating):
        # -inf for formats that encode it (exact torch.max parity even for
        # all -inf columns); finite minimum otherwise.
        if jnp.dtype(dtype).name in ("float16", "bfloat16", "float32", "float64"):
            mask_value = float("-inf")
        else:
            mask_value = float(jnp.finfo(dtype).min)
    elif jnp.issubdtype(dtype, jnp.integer):
        mask_value = int(jnp.iinfo(dtype).min)
    else:
        raise TypeError(f"unsupported dtype for max pooling: {dtype}")

    # ---- Batch tile: a divisor of B (<= 8) so the tiling heuristic never
    # explodes for B not divisible by 8, and the batch axis stays parallel.
    if B % 8 == 0:
        b_tile = 8
    elif B <= 8:
        b_tile = B  # full-dim
    else:
        b_tile = 1
        for d in (7, 6, 5, 4, 3, 2):
            if B % d == 0:
                b_tile = d
                break

    # ---- Generation-aware VMEM budget (64 MiB/TC on v7x, 128 MiB v5e/v6e).
    vmem_cap = _vmem_capacity_bytes()
    vmem_limit = min(64 * 1024 * 1024, (vmem_cap * 5) // 8)  # 40 MiB v7x, 64 MiB v5e/v6e
    per_block_budget = vmem_limit // 4                        # double-buffer + headroom

    # ---- Channel tile: full C (no padding -> no extra HBM reads) when C is
    # not 128-aligned; otherwise optionally split so both v7x TensorCores get
    # a parallel axis even for tiny B, and so a minimal block fits the budget.
    c_tile = C
    if C % 128 == 0:
        if (B // b_tile) < 2 and C >= 256:
            cap = min(C // 2, 512)
            c_tile = 128
            d = _round_down(cap, 128)
            while d >= 128:
                if C % d == 0:
                    c_tile = d
                    break
                d -= 128
        while c_tile > 128 and b_tile * pack * c_tile * itemsize > per_block_budget:
            d = c_tile - 128
            while d >= 128 and C % d != 0:
                d -= 128
            c_tile = max(d, 128)

    # ---- Time tile: as many sublane rows as the budget allows (amortizes the
    # ~0.35us per-grid-step overhead against v7x's 3.2 TB/s HBM), a multiple of
    # the sublane packing, never exceeding T. Ragged T handled by the in-kernel
    # mask — no host-side pad, no extra HBM traffic.
    if T >= pack:
        rows = per_block_budget // max(1, b_tile * c_tile * itemsize)
        t_tile = max(pack, _round_down(rows, pack))
        t_tile = min(t_tile, 256 * pack)          # 2048 f32 / 4096 bf16 rows
        t_tile = min(t_tile, _round_down(T, pack))
        acc_rows = pack
    else:
        t_tile = T                                # full-dim exception (T < pack)
        acc_rows = T

    grid = (B // b_tile, C // c_tile, pl.cdiv(T, t_tile))
    needs_mask = (T % t_tile) != 0

    # Guard pathological shapes: always leave room for the double-buffered block.
    block_bytes = b_tile * t_tile * c_tile * itemsize
    vmem_limit = max(vmem_limit, min(vmem_cap, 2 * block_bytes + (2 << 20)))

    kernel = functools.partial(
        _finalpool_kernel, seq_len=T, mask_value=mask_value, needs_mask=needs_mask
    )

    return pl.pallas_call(
        kernel,
        out_shape=jax.ShapeDtypeStruct((B, C), dtype),
        grid_spec=pltpu.PrefetchScalarGridSpec(
            num_scalar_prefetch=0,
            grid=grid,
            in_specs=[
                pl.BlockSpec((b_tile, t_tile, c_tile), lambda b, c, t: (b, t, c)),
            ],
            out_specs=pl.BlockSpec((b_tile, c_tile), lambda b, c, t: (b, c)),
            scratch_shapes=[pltpu.VMEM((b_tile, acc_rows, c_tile), dtype)],
        ),
        compiler_params=pltpu.CompilerParams(
            dimension_semantics=("parallel", "parallel", "arbitrary"),
            vmem_limit_bytes=int(vmem_limit),
        ),
    )(x)


if __name__ == "__main__":
    key = jax.random.PRNGKey(0)
    k0, k1, k2, k3 = jax.random.split(key, 4)

    # Base shape matching the PyTorch module's (batch, T, Cin) contract.
    B, T, C = 2, 16, 32
    x = jax.random.normal(k0, (B, T, C), dtype=jnp.float32)
    out = jax.block_until_ready(final_pool(x))
    ref = jnp.max(x, axis=1)  # torch.max(dim=1)[0]
    assert out.shape == (B, C)
    assert jnp.allclose(out, ref), "mismatch vs reference"

    # Ragged T (T not a multiple of the T tile) -> in-kernel mask path.
    x2 = jax.random.normal(k1, (2, 21, 32), dtype=jnp.float32)
    out2 = jax.block_until_ready(final_pool(x2))
    assert jnp.allclose(out2, jnp.max(x2, axis=1)), "ragged-T mismatch"

    # Small B + 128-aligned C -> channel-split parallel axis path.
    x3 = jax.random.normal(k2, (1, 40, 256), dtype=jnp.float32)
    out3 = jax.block_until_ready(final_pool(x3))
    assert jnp.allclose(out3, jnp.max(x3, axis=1)), "C-split mismatch"

    # T shorter than the sublane packing -> full-dim T tile path.
    x4 = jax.random.normal(k3, (2, 5, 32), dtype=jnp.float32)
    out4 = jax.block_until_ready(final_pool(x4))
    assert jnp.allclose(out4, jnp.max(x4, axis=1)), "short-T mismatch"

    print("KERNEL_OK")
</pallas_src>

<mosaic_0001>
module attributes {stable_mosaic.version = 11 : i64} {
  func.func @_finalpool_kernel(%arg0: i32, %arg1: i32, %arg2: i32, %arg3: memref<2x16x32xf32, #tpu.memory_space<vmem>>, %arg4: memref<2x32xf32, #tpu.memory_space<vmem>>, %arg5: memref<2x8x32xf32, #tpu.memory_space<vmem>>) attributes {dimension_semantics = [#tpu.dimension_semantics<parallel>, #tpu.dimension_semantics<parallel>, #tpu.dimension_semantics<arbitrary>], iteration_bounds = array<i64: 1, 1, 1>, scalar_prefetch = 0 : i64, scratch_operands = 1 : i64, tpu.core_type = #tpu.core_type<tc>, window_params = [{transform_indices = @transform_0, window_bounds = array<i64: 2, 16, 32>}, {transform_indices = @transform_1, window_bounds = array<i64: 2, 32>}]} {
    %c0 = arith.constant 0 : index
    %c0_0 = arith.constant 0 : index
    %c0_1 = arith.constant 0 : index
    %0 = vector.load %arg3[%c0, %c0_0, %c0_1] : memref<2x16x32xf32, #tpu.memory_space<vmem>>, vector<2x16x32xf32>
    %1 = vector.shape_cast %0 : vector<2x16x32xf32> to vector<2x2x8x32xf32>
    %cst = arith.constant dense<0xFF800000> : vector<2x8x32xf32>
    %2 = vector.multi_reduction <maximumf>, %1, %cst [1] : vector<2x2x8x32xf32> to vector<2x8x32xf32>
    %c0_i32 = arith.constant 0 : i32
    %3 = arith.cmpi eq, %arg2, %c0_i32 : i32
    %4 = arith.extui %3 : i1 to i32
    %c0_i32_2 = arith.constant 0 : i32
    %5 = arith.cmpi ne, %4, %c0_i32_2 : i32
    scf.if %5 {
      %c0_7 = arith.constant 0 : index
      %c0_8 = arith.constant 0 : index
      %c0_9 = arith.constant 0 : index
      %12 = vector.load %arg5[%c0_7, %c0_8, %c0_9] : memref<2x8x32xf32, #tpu.memory_space<vmem>>, vector<2x8x32xf32>
      tpu.vector_store %arg5[%c0_7, %c0_8, %c0_9], %2 {strides = array<i32>} : memref<2x8x32xf32, #tpu.memory_space<vmem>>, vector<2x8x32xf32>,
    } else {
    }
    %c0_i32_3 = arith.constant 0 : i32
    %6 = arith.cmpi sgt, %arg2, %c0_i32_3 : i32
    %7 = arith.extui %6 : i1 to i32
    %c0_i32_4 = arith.constant 0 : i32
    %8 = arith.cmpi ne, %7, %c0_i32_4 : i32
    scf.if %8 {
      %c0_7 = arith.constant 0 : index
      %c0_8 = arith.constant 0 : index
      %c0_9 = arith.constant 0 : index
      %12 = vector.load %arg5[%c0_7, %c0_8, %c0_9] : memref<2x8x32xf32, #tpu.memory_space<vmem>>, vector<2x8x32xf32>
      %13 = arith.maximumf %12, %2 : vector<2x8x32xf32>
      %c0_10 = arith.constant 0 : index
      %c0_11 = arith.constant 0 : index
      %c0_12 = arith.constant 0 : index
      %14 = vector.load %arg5[%c0_10, %c0_11, %c0_12] : memref<2x8x32xf32, #tpu.memory_space<vmem>>, vector<2x8x32xf32>
      tpu.vector_store %arg5[%c0_10, %c0_11, %c0_12], %13 {strides = array<i32>} : memref<2x8x32xf32, #tpu.memory_space<vmem>>, vector<2x8x32xf32>,
    } else {
    }
    %c0_i32_5 = arith.constant 0 : i32
    %9 = arith.cmpi eq, %arg2, %c0_i32_5 : i32
    %10 = arith.extui %9 : i1 to i32
    %c0_i32_6 = arith.constant 0 : i32
    %11 = arith.cmpi ne, %10, %c0_i32_6 : i32
    scf.if %11 {
      %c0_7 = arith.constant 0 : index
      %c0_8 = arith.constant 0 : index
      %c0_9 = arith.constant 0 : index
      %12 = vector.load %arg5[%c0_7, %c0_8, %c0_9] : memref<2x8x32xf32, #tpu.memory_space<vmem>>, vector<2x8x32xf32>
      %cst_10 = arith.constant dense<0xFF800000> : vector<2x32xf32>
      %13 = vector.multi_reduction <maximumf>, %12, %cst_10 [1] : vector<2x8x32xf32> to vector<2x32xf32>
      %c0_11 = arith.constant 0 : index
      %c0_12 = arith.constant 0 : index
      %14 = vector.load %arg4[%c0_11, %c0_12] : memref<2x32xf32, #tpu.memory_space<vmem>>, vector<2x32xf32>
      tpu.vector_store %arg4[%c0_11, %c0_12], %13 {strides = array<i32>} : memref<2x32xf32, #tpu.memory_space<vmem>>, vector<2x32xf32>,
    } else {
    }
    return
  }
  func.func @transform_0(%arg0: i32, %arg1: i32, %arg2: i32) -> (i32, i32, i32) {
    %c0_i32 = arith.constant 0 : i32
    return %arg0, %arg2, %arg1 : i32, i32, i32
  }
  func.func @transform_1(%arg0: i32, %arg1: i32, %arg2: i32) -> (i32, i32) {
    %c0_i32 = arith.constant 0 : i32
    return %arg0, %arg1 : i32, i32
  }
}

</mosaic_0001>

<bundles_post_ra>
// kernel: tpu_custom_call.1
= control target key start
LH: loop header
LB: loop body
LE: loop exit
PB: predicated region body
PF: predicated region fallthrough
CT: control target
= control target key end

     0   :  { %6 = vsyncpa [#allocation4], 0  ;;  %s179_s0 = inlined_call_operand.hbm [shape: f32[2,16,32], index: 0, kind: input, shape index: {}]   ;;  %s180_s1 = inlined_call_operand.hbm [shape: f32[2,32], index: 1, kind: output, shape index: {}]  }
   0x1   :  { %7 = vsyncpa [#allocation5], 0  ;;  %s12_s8 = sshll.u32 %s179_s0, 4  ;;  %s151_s9 = smov [#allocation3]   ;;  %s13_s8 = int_to_ptr.hbm [resolvable:$true] %s12_s8 }
   0x2   :  { %s14_s10 = sshll.u32 %s151_s9, 4  ;;  %s152_s11 = smov 128   ;;  %s15_s10 = int_to_ptr.vmem [resolvable:$true] %s14_s10 }
   0x3   :  { %s153_s12 = smov 8  }
   0x4   :  { %20 = dma.hbm_to_vmem [thread:$0]  %s13_s8, 512, %s15_s10, [#allocation4], %s152_s11, %s152_s11, %s153_s12  }
   0x5   :  { %147 = dma.done.wait [#allocation4], 512  }
   0x6   :  { %148 = vsyncadd [#allocation4], 4294966784  ;;  %vm29_vm0 = vcmask 261120   ;;  %v25_v0 = vld [vmem:[#allocation3] sm:$0xff]  ;;  %v26_v1 = vld [vmem:[#allocation3 + $0x8] sm:$0xff]  ;;  %s154_s0 = smov [#allocation6]  }
   0x7   :  { %v27_v2 = vld [vmem:[#allocation3 + $0x10] sm:$0xff]  ;;  %v30_v3 = vsel %vm29_vm0, %v25_v0, -inf  ;;  %v31_v4 = vsel %vm29_vm0, %v26_v1, -inf  ;;  %v28_v5 = vld [vmem:[#allocation3 + $0x18] sm:$0xff]  ;;  %s83_s13 = sshll.u32 %s154_s0, 4  ;;  %s85_s16 = sshll.u32 %s180_s1, 4  ;;  %s84_s13 = int_to_ptr.vmem [resolvable:$true] %s83_s13  ;;  %s86_s16 = int_to_ptr.hbm [resolvable:$true] %s85_s16 }
   0x8   :  { %v33_v6 = vsel %vm29_vm0, %v27_v2, -inf  ;;  %v32_v7 = vmax.f32 %v30_v3, %v31_v4  ;;  %v34_v8 = vsel %vm29_vm0, %v28_v5, -inf  ;;  %vm73_vm1 = vcmask 1041409  }
   0x9   :  { %v35_v9 = vmax.f32 %v33_v6, %v34_v8  ;;  %vm76_vm2 = vcmask 254976  }
   0xa   :  { %40 = vst.msk [vmem:[#allocation2] sm:$0xff] %vm29_vm0, %v32_v7 }
   0xb   :  { %41 = vst.msk [vmem:[#allocation2 + $0x8] sm:$0xff] %vm29_vm0, %v35_v9 }
  0x11   :  { %v55_v10 = vld [vmem:[#allocation2] sm:$0xff] }
  0x12   :  { %v56_v11 = vld [vmem:[#allocation2 + $0x8] sm:$0xff]  ;;  %v57_v12 = vsel %vm29_vm0, %v55_v10, -inf }
  0x13   :  { %v58_v13 = vrot.slane %v57_v12, 4  ;;  %v64_v14 = vsel %vm29_vm0, %v56_v11, -inf }
  0x14   :  { %v65_v15 = vrot.slane %v64_v14, 4 }
  0x15   :  { %v59_v16 = vmax.f32 %v57_v12, %v58_v13 }
  0x16   :  { %v66_v17 = vmax.f32 %v64_v14, %v65_v15 }
  0x17   :  { %v60_v18 = vrot.slane %v59_v16, 2 }
  0x18   :  { %v67_v19 = vrot.slane %v66_v17, 2 }
  0x19   :  { %v61_v20 = vmax.f32 %v59_v16, %v60_v18 }
  0x1a   :  { %v68_v21 = vmax.f32 %v66_v17, %v67_v19 }
  0x1b   :  { %v62_v22 = vrot.slane %v61_v20, 1 }
  0x1c   :  { %v69_v23 = vrot.slane %v68_v21, 1 }
  0x1d   :  { %v63_v24 = vmax.f32 %v61_v20, %v62_v22 }
  0x1e   :  { %v70_v25 = vmax.f32 %v68_v21, %v69_v23 }
  0x20   :  { %v74_v26 = vsel %vm73_vm1, %v70_v25, %v63_v24 }
  0x21   :  { %77 = vst.msk [vmem:[#allocation6] sm:$0x3] %vm76_vm2, %v74_v26 }
  0x22   :  { %88 = dma.vmem_to_hbm [thread:$0]  %s84_s13, 32, %s86_s16, [#allocation5]  }
  0x23   :  { %149 = dma.done.wait [#allocation5], 32  }
  0x24   :  { %150 = vsyncadd [#allocation5], 4294967264 }
  0x25   :  { %93 = vsyncpa [#allocation4], 1 }
  0x26   :  { %94 = vsyncpa [#allocation5], 1 }

</bundles_post_ra>
